<compile_context>
chip_gen: v6e
topology: v6e:2x2x1
jax: 0.10.0
libtpu: 0.0.40
codegen_flags: <defaults>
</compile_context>

<pallas_src>
import math

import jax
import jax.numpy as jnp
from jax import lax
from jax.experimental import pallas as pl
from jax.experimental.pallas import tpu as pltpu

# ----------------------------- config (small) ------------------------------
BATCH = 2
SEQ = 8
HIDDEN = 32
NUM_HEADS = 4
NUM_KV_HEADS = 2
HEAD_DIM = HIDDEN // NUM_HEADS          # 8
N_REP = NUM_HEADS // NUM_KV_HEADS       # 2
KV_DIM = NUM_KV_HEADS * HEAD_DIM        # 16
ROPE_THETA = 10000.0
HALF = HEAD_DIM // 2


# ------------------------------ Pallas kernel ------------------------------
def _swap_halves(t, n_heads):
    """Per-head unsigned half swap: cat(x2, x1) per head along lanes.

    The sign of rotate_half (cat(-x2, x1)) is folded into the sin table, so
    this helper only permutes lanes.  At head_dim=128 this would be a single
    pltpu.roll(t, HEAD_DIM // 2, axis=-1) per (…, 128) slab.
    """
    parts = []
    for h in range(n_heads):
        c = h * HEAD_DIM
        parts.append(t[:, c + HALF:c + HEAD_DIM])
        parts.append(t[:, c:c + HALF])
    return jnp.concatenate(parts, axis=-1)


def qwen2_attn_kernel(x_ref, wq_ref, bq_ref, wk_ref, bk_ref, wv_ref, bv_ref,
                      wo_ref, cos_ref, sin_ref, o_ref):
    """One batch row: QKV projections + RoPE + GQA causal attention + o_proj.

    x_ref: (S, H) bf16            wq/wo: (H, H) bf16, wk/wv: (H, KV) bf16
    bq: (1, H) f32 (pre-scaled)   bk/bv: (1, KV) f32
    cos_ref: (S, D) f32           sin_ref: (S, D) f32, first half sign-folded
    o_ref: (S, H) bf16
    """
    f32 = jnp.float32
    bf16 = jnp.bfloat16

    x = x_ref[...]                                               # (S, H) bf16

    # --- QKV projections (bf16 MXU operands, f32 accumulation) ---
    # 1/sqrt(head_dim) is already folded into wq_ref / bq_ref.
    q = jnp.dot(x, wq_ref[...], preferred_element_type=f32) + bq_ref[...]
    k = jnp.dot(x, wk_ref[...], preferred_element_type=f32) + bk_ref[...]
    v = jnp.dot(x, wv_ref[...], preferred_element_type=f32) + bv_ref[...]

    # --- RoPE on whole f32 slabs; compact (S, D) tables tiled across heads ---
    cos_t = cos_ref[...]                                         # (S, D)
    sin_t = sin_ref[...]                                         # (S, D), signed
    cos_q = jnp.concatenate([cos_t] * NUM_HEADS, axis=-1)        # (S, H)
    sin_q = jnp.concatenate([sin_t] * NUM_HEADS, axis=-1)
    cos_k = jnp.concatenate([cos_t] * NUM_KV_HEADS, axis=-1)     # (S, KV)
    sin_k = jnp.concatenate([sin_t] * NUM_KV_HEADS, axis=-1)

    q = q * cos_q + _swap_halves(q, NUM_HEADS) * sin_q           # (S, H)  f32
    k = k * cos_k + _swap_halves(k, NUM_KV_HEADS) * sin_k        # (S, KV) f32

    # --- hoisted bf16 casts: whole slabs, once ---
    q_bf = q.astype(bf16)
    k_bf = k.astype(bf16)
    v_bf = v.astype(bf16)

    # --- causal mask generated in-kernel (no DMA, no concatenate) ---
    ri = lax.broadcasted_iota(jnp.int32, (SEQ, SEQ), 0)
    ci = lax.broadcasted_iota(jnp.int32, (SEQ, SEQ), 1)
    mask = jnp.where(ci <= ri, 0.0, -1e9).astype(f32)            # (S, S)

    # --- GQA attention; each head's output folds straight into o_proj ---
    # out = sum_h  softmax(q_h k_g^T + mask) v_g @ Wo^T[hD:(h+1)D, :]
    out_acc = jnp.zeros((SEQ, HIDDEN), f32)
    for g in range(NUM_KV_HEADS):
        c0 = g * HEAD_DIM
        k_g = k_bf[:, c0:c0 + HEAD_DIM]                          # (S, D)
        v_g = v_bf[:, c0:c0 + HEAD_DIM]                          # (S, D)
        for r in range(N_REP):
            h = g * N_REP + r
            q_h = q_bf[:, h * HEAD_DIM:(h + 1) * HEAD_DIM]       # (S, D)
            # scores (pre-scaled); rhs contraction on dim 1 (negligible at D=8;
            # at D=128 pass K pre-transposed instead).
            s = lax.dot_general(q_h, k_g, (((1,), (1,)), ((), ())),
                                preferred_element_type=f32) + mask
            s_max = jnp.max(s, axis=-1, keepdims=True)
            p = jnp.exp(s - s_max)
            p = p / jnp.sum(p, axis=-1, keepdims=True)           # exact softmax
            o_h = jnp.dot(p.astype(bf16), v_g,
                          preferred_element_type=f32)            # (S, D) f32
            wo_h = wo_ref[h * HEAD_DIM:(h + 1) * HEAD_DIM, :]    # (D, H) bf16
            out_acc = out_acc + jnp.dot(o_h.astype(bf16), wo_h,
                                        preferred_element_type=f32)

    o_ref[...] = out_acc.astype(o_ref.dtype)


# --------------------------------- wrapper ----------------------------------
def qwen2_attention_pallas(x, Wq, bq, Wk, bk, Wv, bv, Wo, cos, sin):
    B, S, H = x.shape
    scale = 1.0 / math.sqrt(HEAD_DIM)

    # Weights pre-transposed to (in, out); bf16 operands; scale folded into q.
    x2d = x.reshape(B * S, H).astype(jnp.bfloat16)
    wq_t = (Wq.T * scale).astype(jnp.bfloat16)
    wk_t = Wk.T.astype(jnp.bfloat16)
    wv_t = Wv.T.astype(jnp.bfloat16)
    wo_t = Wo.T.astype(jnp.bfloat16)
    bq2 = (bq * scale)[None, :].astype(jnp.float32)
    bk2 = bk[None, :].astype(jnp.float32)
    bv2 = bv[None, :].astype(jnp.float32)

    # Compact (S, D) rope tables; the sign of rotate_half's first half is
    # folded into the sin table so the in-kernel swap is sign-free.
    cos_tbl = cos.astype(jnp.float32)                                  # (S, D)
    sin_tbl = jnp.concatenate([-sin[:, :HALF], sin[:, HALF:]],
                              axis=-1).astype(jnp.float32)             # (S, D)

    out2d = pl.pallas_call(
        qwen2_attn_kernel,
        out_shape=jax.ShapeDtypeStruct((B * S, H), jnp.bfloat16),
        grid=(B,),
        in_specs=[
            pl.BlockSpec((S, H), lambda b: (b, 0)),          # x (per batch)
            pl.BlockSpec((H, H), lambda b: (0, 0)),          # wq_t (pre-scaled)
            pl.BlockSpec((1, H), lambda b: (0, 0)),          # bq (pre-scaled)
            pl.BlockSpec((H, KV_DIM), lambda b: (0, 0)),     # wk_t
            pl.BlockSpec((1, KV_DIM), lambda b: (0, 0)),     # bk
            pl.BlockSpec((H, KV_DIM), lambda b: (0, 0)),     # wv_t
            pl.BlockSpec((1, KV_DIM), lambda b: (0, 0)),     # bv
            pl.BlockSpec((H, H), lambda b: (0, 0)),          # wo_t
            pl.BlockSpec((S, HEAD_DIM), lambda b: (0, 0)),   # cos (S, D)
            pl.BlockSpec((S, HEAD_DIM), lambda b: (0, 0)),   # sin (S, D), signed
        ],
        out_specs=pl.BlockSpec((S, H), lambda b: (b, 0)),
        compiler_params=pltpu.CompilerParams(
            dimension_semantics=("parallel",),
            vmem_limit_bytes=32 * 1024 * 1024),
    )(x2d, wq_t, bq2, wk_t, bk2, wv_t, bv2, wo_t, cos_tbl, sin_tbl)

    return out2d.astype(jnp.float32).reshape(B, S, H)


# --------------------------- pure-JAX reference -----------------------------
def rotate_half_ref(t):
    d = t.shape[-1]
    return jnp.concatenate([-t[..., d // 2:], t[..., :d // 2]], axis=-1)


def qwen2_attention_ref(x, Wq, bq, Wk, bk, Wv, bv, Wo, cos, sin,
                        position_ids, mask4d):
    B, S, H = x.shape
    q = x @ Wq.T + bq
    k = x @ Wk.T + bk
    v = x @ Wv.T + bv
    q = q.reshape(B, S, NUM_HEADS, HEAD_DIM).transpose(0, 2, 1, 3)
    k = k.reshape(B, S, NUM_KV_HEADS, HEAD_DIM).transpose(0, 2, 1, 3)
    v = v.reshape(B, S, NUM_KV_HEADS, HEAD_DIM).transpose(0, 2, 1, 3)
    cos_p = cos[position_ids][:, None]
    sin_p = sin[position_ids][:, None]
    q = q * cos_p + rotate_half_ref(q) * sin_p
    k = k * cos_p + rotate_half_ref(k) * sin_p
    k = jnp.repeat(k, N_REP, axis=1)
    v = jnp.repeat(v, N_REP, axis=1)
    s = q @ k.transpose(0, 1, 3, 2) / math.sqrt(HEAD_DIM) + mask4d
    p = jax.nn.softmax(s.astype(jnp.float32), axis=-1)
    o = p @ v
    o = o.transpose(0, 2, 1, 3).reshape(B, S, H)
    return o @ Wo.T


# ---------------------------------- main ------------------------------------
if __name__ == "__main__":
    key = jax.random.PRNGKey(0)
    k_x, k_wq, k_bq, k_wk, k_bk, k_wv, k_bv, k_wo = jax.random.split(key, 8)

    x = jax.random.normal(k_x, (BATCH, SEQ, HIDDEN), dtype=jnp.float32)

    # PyTorch-convention weights: (out_features, in_features)
    Wq = 0.05 * jax.random.normal(k_wq, (HIDDEN, HIDDEN), dtype=jnp.float32)
    bq = 0.05 * jax.random.normal(k_bq, (HIDDEN,), dtype=jnp.float32)
    Wk = 0.05 * jax.random.normal(k_wk, (KV_DIM, HIDDEN), dtype=jnp.float32)
    bk = 0.05 * jax.random.normal(k_bk, (KV_DIM,), dtype=jnp.float32)
    Wv = 0.05 * jax.random.normal(k_wv, (KV_DIM, HIDDEN), dtype=jnp.float32)
    bv = 0.05 * jax.random.normal(k_bv, (KV_DIM,), dtype=jnp.float32)
    Wo = 0.05 * jax.random.normal(k_wo, (HIDDEN, HIDDEN), dtype=jnp.float32)

    # Rotary embedding tables (Qwen2RotaryEmbedding semantics)
    inv_freq = 1.0 / (ROPE_THETA ** (jnp.arange(0, HEAD_DIM, 2,
                                                dtype=jnp.float32) / HEAD_DIM))
    t = jnp.arange(SEQ, dtype=jnp.float32)
    freqs = jnp.outer(t, inv_freq)                       # (S, D/2)
    emb = jnp.concatenate([freqs, freqs], axis=-1)       # (S, D)
    cos = jnp.cos(emb)
    sin = jnp.sin(emb)

    position_ids = jnp.broadcast_to(jnp.arange(SEQ), (BATCH, SEQ))

    # HF-style additive causal mask (reference only; kernel builds its own).
    i = jnp.arange(SEQ)[:, None]
    j = jnp.arange(SEQ)[None, :]
    causal = jnp.where(j <= i, 0.0, -1e9).astype(jnp.float32)
    mask4d = jnp.broadcast_to(causal, (BATCH, 1, SEQ, SEQ))

    out = qwen2_attention_pallas(x, Wq, bq, Wk, bk, Wv, bv, Wo, cos, sin)
    out = jax.block_until_ready(out)

    ref = qwen2_attention_ref(x, Wq, bq, Wk, bk, Wv, bv, Wo, cos, sin,
                              position_ids, mask4d)
    ref = jax.block_until_ready(ref)

    assert out.shape == (BATCH, SEQ, HIDDEN)
    # Tolerance reflects bf16 matmul operands / bf16 output (f32 accumulation).
    if not jnp.allclose(out, ref, atol=2e-2, rtol=2e-2):
        err = float(jnp.max(jnp.abs(out - ref)))
        raise AssertionError(f"Pallas output mismatch vs reference (max |err|={err})")

    print("KERNEL_OK")
</pallas_src>

<mosaic_0001>
module attributes {stable_mosaic.version = 11 : i64} {
  func.func @qwen2_attn_kernel(%arg0: i32, %arg1: memref<8x32xbf16, #tpu.memory_space<vmem>>, %arg2: memref<32x32xbf16, #tpu.memory_space<vmem>>, %arg3: memref<1x32xf32, #tpu.memory_space<vmem>>, %arg4: memref<32x16xbf16, #tpu.memory_space<vmem>>, %arg5: memref<1x16xf32, #tpu.memory_space<vmem>>, %arg6: memref<32x16xbf16, #tpu.memory_space<vmem>>, %arg7: memref<1x16xf32, #tpu.memory_space<vmem>>, %arg8: memref<32x32xbf16, #tpu.memory_space<vmem>>, %arg9: memref<8x8xf32, #tpu.memory_space<vmem>>, %arg10: memref<8x8xf32, #tpu.memory_space<vmem>>, %arg11: memref<8x32xbf16, #tpu.memory_space<vmem>>) attributes {dimension_semantics = [#tpu.dimension_semantics<parallel>], iteration_bounds = array<i64: 2>, scalar_prefetch = 0 : i64, scratch_operands = 0 : i64, tpu.core_type = #tpu.core_type<tc>, window_params = [{transform_indices = @transform_0, window_bounds = array<i64: 8, 32>}, {pipeline_mode = #tpu.pipeline_mode<synchronous>, transform_indices = @transform_1, window_bounds = array<i64: 32, 32>}, {pipeline_mode = #tpu.pipeline_mode<synchronous>, transform_indices = @transform_2, window_bounds = array<i64: 1, 32>}, {pipeline_mode = #tpu.pipeline_mode<synchronous>, transform_indices = @transform_3, window_bounds = array<i64: 32, 16>}, {pipeline_mode = #tpu.pipeline_mode<synchronous>, transform_indices = @transform_4, window_bounds = array<i64: 1, 16>}, {pipeline_mode = #tpu.pipeline_mode<synchronous>, transform_indices = @transform_5, window_bounds = array<i64: 32, 16>}, {pipeline_mode = #tpu.pipeline_mode<synchronous>, transform_indices = @transform_6, window_bounds = array<i64: 1, 16>}, {pipeline_mode = #tpu.pipeline_mode<synchronous>, transform_indices = @transform_7, window_bounds = array<i64: 32, 32>}, {pipeline_mode = #tpu.pipeline_mode<synchronous>, transform_indices = @transform_8, window_bounds = array<i64: 8, 8>}, {pipeline_mode = #tpu.pipeline_mode<synchronous>, transform_indices = @transform_9, window_bounds = array<i64: 8, 8>}, {transform_indices = @transform_10, window_bounds = array<i64: 8, 32>}]} {
    %c0 = arith.constant 0 : index
    %c0_0 = arith.constant 0 : index
    %0 = vector.load %arg1[%c0, %c0_0] : memref<8x32xbf16, #tpu.memory_space<vmem>>, vector<8x32xbf16>
    %c0_1 = arith.constant 0 : index
    %c0_2 = arith.constant 0 : index
    %1 = vector.load %arg2[%c0_1, %c0_2] : memref<32x32xbf16, #tpu.memory_space<vmem>>, vector<32x32xbf16>
    %cst = arith.constant dense<0.000000e+00> : vector<8x32xf32>
    %2 = tpu.matmul %0, %1, %cst {dimension_numbers = #tpu.dot_dimension_numbers<[1], [0], [0], [1], [0, 0, 1, 1], [], []>} : vector<8x32xbf16>, vector<32x32xbf16>, vector<8x32xf32> -> vector<8x32xf32>
    %c0_3 = arith.constant 0 : index
    %c0_4 = arith.constant 0 : index
    %3 = vector.load %arg3[%c0_3, %c0_4] : memref<1x32xf32, #tpu.memory_space<vmem>>, vector<1x32xf32>
    %4 = vector.broadcast %3 : vector<1x32xf32> to vector<8x32xf32>
    %5 = arith.addf %2, %4 : vector<8x32xf32>
    %c0_5 = arith.constant 0 : index
    %c0_6 = arith.constant 0 : index
    %6 = vector.load %arg4[%c0_5, %c0_6] : memref<32x16xbf16, #tpu.memory_space<vmem>>, vector<32x16xbf16>
    %cst_7 = arith.constant dense<0.000000e+00> : vector<8x16xf32>
    %7 = tpu.matmul %0, %6, %cst_7 {dimension_numbers = #tpu.dot_dimension_numbers<[1], [0], [0], [1], [0, 0, 1, 1], [], []>} : vector<8x32xbf16>, vector<32x16xbf16>, vector<8x16xf32> -> vector<8x16xf32>
    %c0_8 = arith.constant 0 : index
    %c0_9 = arith.constant 0 : index
    %8 = vector.load %arg5[%c0_8, %c0_9] : memref<1x16xf32, #tpu.memory_space<vmem>>, vector<1x16xf32>
    %9 = vector.broadcast %8 : vector<1x16xf32> to vector<8x16xf32>
    %10 = arith.addf %7, %9 : vector<8x16xf32>
    %c0_10 = arith.constant 0 : index
    %c0_11 = arith.constant 0 : index
    %11 = vector.load %arg6[%c0_10, %c0_11] : memref<32x16xbf16, #tpu.memory_space<vmem>>, vector<32x16xbf16>
    %cst_12 = arith.constant dense<0.000000e+00> : vector<8x16xf32>
    %12 = tpu.matmul %0, %11, %cst_12 {dimension_numbers = #tpu.dot_dimension_numbers<[1], [0], [0], [1], [0, 0, 1, 1], [], []>} : vector<8x32xbf16>, vector<32x16xbf16>, vector<8x16xf32> -> vector<8x16xf32>
    %c0_13 = arith.constant 0 : index
    %c0_14 = arith.constant 0 : index
    %13 = vector.load %arg7[%c0_13, %c0_14] : memref<1x16xf32, #tpu.memory_space<vmem>>, vector<1x16xf32>
    %14 = vector.broadcast %13 : vector<1x16xf32> to vector<8x16xf32>
    %15 = arith.addf %12, %14 : vector<8x16xf32>
    %c0_15 = arith.constant 0 : index
    %c0_16 = arith.constant 0 : index
    %16 = vector.load %arg9[%c0_15, %c0_16] : memref<8x8xf32, #tpu.memory_space<vmem>>, vector<8x8xf32>
    %c0_17 = arith.constant 0 : index
    %c0_18 = arith.constant 0 : index
    %17 = vector.load %arg10[%c0_17, %c0_18] : memref<8x8xf32, #tpu.memory_space<vmem>>, vector<8x8xf32>
    %18 = tpu.concatenate %16, %16, %16, %16 in 1 : vector<8x8xf32>, vector<8x8xf32>, vector<8x8xf32>, vector<8x8xf32> -> vector<8x32xf32>
    %19 = tpu.concatenate %17, %17, %17, %17 in 1 : vector<8x8xf32>, vector<8x8xf32>, vector<8x8xf32>, vector<8x8xf32> -> vector<8x32xf32>
    %20 = tpu.concatenate %16, %16 in 1 : vector<8x8xf32>, vector<8x8xf32> -> vector<8x16xf32>
    %21 = tpu.concatenate %17, %17 in 1 : vector<8x8xf32>, vector<8x8xf32> -> vector<8x16xf32>
    %22 = arith.mulf %5, %18 : vector<8x32xf32>
    %23 = vector.extract_strided_slice %5 {offsets = [0, 4], sizes = [8, 4], strides = [1, 1]} : vector<8x32xf32> to vector<8x4xf32>
    %24 = vector.extract_strided_slice %5 {offsets = [0, 0], sizes = [8, 4], strides = [1, 1]} : vector<8x32xf32> to vector<8x4xf32>
    %25 = vector.extract_strided_slice %5 {offsets = [0, 12], sizes = [8, 4], strides = [1, 1]} : vector<8x32xf32> to vector<8x4xf32>
    %26 = vector.extract_strided_slice %5 {offsets = [0, 8], sizes = [8, 4], strides = [1, 1]} : vector<8x32xf32> to vector<8x4xf32>
    %27 = vector.extract_strided_slice %5 {offsets = [0, 20], sizes = [8, 4], strides = [1, 1]} : vector<8x32xf32> to vector<8x4xf32>
    %28 = vector.extract_strided_slice %5 {offsets = [0, 16], sizes = [8, 4], strides = [1, 1]} : vector<8x32xf32> to vector<8x4xf32>
    %29 = vector.extract_strided_slice %5 {offsets = [0, 28], sizes = [8, 4], strides = [1, 1]} : vector<8x32xf32> to vector<8x4xf32>
    %30 = vector.extract_strided_slice %5 {offsets = [0, 24], sizes = [8, 4], strides = [1, 1]} : vector<8x32xf32> to vector<8x4xf32>
    %31 = tpu.concatenate %23, %24, %25, %26, %27, %28, %29, %30 in 1 : vector<8x4xf32>, vector<8x4xf32>, vector<8x4xf32>, vector<8x4xf32>, vector<8x4xf32>, vector<8x4xf32>, vector<8x4xf32>, vector<8x4xf32> -> vector<8x32xf32>
    %32 = arith.mulf %31, %19 : vector<8x32xf32>
    %33 = arith.addf %22, %32 : vector<8x32xf32>
    %34 = arith.mulf %10, %20 : vector<8x16xf32>
    %35 = vector.extract_strided_slice %10 {offsets = [0, 4], sizes = [8, 4], strides = [1, 1]} : vector<8x16xf32> to vector<8x4xf32>
    %36 = vector.extract_strided_slice %10 {offsets = [0, 0], sizes = [8, 4], strides = [1, 1]} : vector<8x16xf32> to vector<8x4xf32>
    %37 = vector.extract_strided_slice %10 {offsets = [0, 12], sizes = [8, 4], strides = [1, 1]} : vector<8x16xf32> to vector<8x4xf32>
    %38 = vector.extract_strided_slice %10 {offsets = [0, 8], sizes = [8, 4], strides = [1, 1]} : vector<8x16xf32> to vector<8x4xf32>
    %39 = tpu.concatenate %35, %36, %37, %38 in 1 : vector<8x4xf32>, vector<8x4xf32>, vector<8x4xf32>, vector<8x4xf32> -> vector<8x16xf32>
    %40 = arith.mulf %39, %21 : vector<8x16xf32>
    %41 = arith.addf %34, %40 : vector<8x16xf32>
    %42 = arith.truncf %33 : vector<8x32xf32> to vector<8x32xbf16>
    %43 = arith.truncf %41 : vector<8x16xf32> to vector<8x16xbf16>
    %44 = arith.truncf %15 : vector<8x16xf32> to vector<8x16xbf16>
    %45 = tpu.iota {dimensions = array<i32: 0>} : vector<8x8xi32>
    %46 = tpu.iota {dimensions = array<i32: 1>} : vector<8x8xi32>
    %47 = arith.cmpi sle, %46, %45 : vector<8x8xi32>
    %cst_19 = arith.constant 0.000000e+00 : f32
    %cst_20 = arith.constant -1.000000e+09 : f32
    %48 = vector.broadcast %cst_19 : f32 to vector<8x8xf32>
    %49 = vector.broadcast %cst_20 : f32 to vector<8x8xf32>
    %50 = arith.select %47, %48, %49 : vector<8x8xi1>, vector<8x8xf32>
    %cst_21 = arith.constant 0.000000e+00 : f32
    %51 = vector.broadcast %cst_21 : f32 to vector<8x32xf32>
    %52 = vector.extract_strided_slice %43 {offsets = [0, 0], sizes = [8, 8], strides = [1, 1]} : vector<8x16xbf16> to vector<8x8xbf16>
    %53 = vector.extract_strided_slice %44 {offsets = [0, 0], sizes = [8, 8], strides = [1, 1]} : vector<8x16xbf16> to vector<8x8xbf16>
    %54 = vector.extract_strided_slice %42 {offsets = [0, 0], sizes = [8, 8], strides = [1, 1]} : vector<8x32xbf16> to vector<8x8xbf16>
    %cst_22 = arith.constant dense<0.000000e+00> : vector<8x8xf32>
    %55 = tpu.matmul %54, %52, %cst_22 {dimension_numbers = #tpu.dot_dimension_numbers<[1], [1], [0], [0], [0, 0, 1, 0], [], []>} : vector<8x8xbf16>, vector<8x8xbf16>, vector<8x8xf32> -> vector<8x8xf32>
    %56 = arith.addf %55, %50 : vector<8x8xf32>
    %cst_23 = arith.constant dense<0xFF800000> : vector<8xf32>
    %57 = vector.multi_reduction <maximumf>, %56, %cst_23 [1] : vector<8x8xf32> to vector<8xf32>
    %58 = vector.shape_cast %57 : vector<8xf32> to vector<8x1xf32>
    %59 = vector.broadcast %58 : vector<8x1xf32> to vector<8x8xf32>
    %60 = arith.subf %56, %59 : vector<8x8xf32>
    %61 = math.exp %60 : vector<8x8xf32>
    %cst_24 = arith.constant dense<0.000000e+00> : vector<8xf32>
    %62 = vector.multi_reduction <add>, %61, %cst_24 [1] : vector<8x8xf32> to vector<8xf32>
    %63 = vector.shape_cast %62 : vector<8xf32> to vector<8x1xf32>
    %64 = vector.broadcast %63 : vector<8x1xf32> to vector<8x8xf32>
    %65 = arith.divf %61, %64 : vector<8x8xf32>
    %66 = arith.truncf %65 : vector<8x8xf32> to vector<8x8xbf16>
    %cst_25 = arith.constant dense<0.000000e+00> : vector<8x8xf32>
    %67 = tpu.matmul %66, %53, %cst_25 {dimension_numbers = #tpu.dot_dimension_numbers<[1], [0], [0], [1], [0, 0, 1, 1], [], []>} : vector<8x8xbf16>, vector<8x8xbf16>, vector<8x8xf32> -> vector<8x8xf32>
    %c0_26 = arith.constant 0 : index
    %c0_27 = arith.constant 0 : index
    %68 = vector.load %arg8[%c0_26, %c0_27] : memref<32x32xbf16, #tpu.memory_space<vmem>>, vector<8x32xbf16>
    %69 = arith.truncf %67 : vector<8x8xf32> to vector<8x8xbf16>
    %cst_28 = arith.constant dense<0.000000e+00> : vector<8x32xf32>
    %70 = tpu.matmul %69, %68, %cst_28 {dimension_numbers = #tpu.dot_dimension_numbers<[1], [0], [0], [1], [0, 0, 1, 1], [], []>} : vector<8x8xbf16>, vector<8x32xbf16>, vector<8x32xf32> -> vector<8x32xf32>
    %71 = arith.addf %51, %70 : vector<8x32xf32>
    %72 = vector.extract_strided_slice %42 {offsets = [0, 8], sizes = [8, 8], strides = [1, 1]} : vector<8x32xbf16> to vector<8x8xbf16>
    %cst_29 = arith.constant dense<0.000000e+00> : vector<8x8xf32>
    %73 = tpu.matmul %72, %52, %cst_29 {dimension_numbers = #tpu.dot_dimension_numbers<[1], [1], [0], [0], [0, 0, 1, 0], [], []>} : vector<8x8xbf16>, vector<8x8xbf16>, vector<8x8xf32> -> vector<8x8xf32>
    %74 = arith.addf %73, %50 : vector<8x8xf32>
    %cst_30 = arith.constant dense<0xFF800000> : vector<8xf32>
    %75 = vector.multi_reduction <maximumf>, %74, %cst_30 [1] : vector<8x8xf32> to vector<8xf32>
    %76 = vector.shape_cast %75 : vector<8xf32> to vector<8x1xf32>
    %77 = vector.broadcast %76 : vector<8x1xf32> to vector<8x8xf32>
    %78 = arith.subf %74, %77 : vector<8x8xf32>
    %79 = math.exp %78 : vector<8x8xf32>
    %cst_31 = arith.constant dense<0.000000e+00> : vector<8xf32>
    %80 = vector.multi_reduction <add>, %79, %cst_31 [1] : vector<8x8xf32> to vector<8xf32>
    %81 = vector.shape_cast %80 : vector<8xf32> to vector<8x1xf32>
    %82 = vector.broadcast %81 : vector<8x1xf32> to vector<8x8xf32>
    %83 = arith.divf %79, %82 : vector<8x8xf32>
    %84 = arith.truncf %83 : vector<8x8xf32> to vector<8x8xbf16>
    %cst_32 = arith.constant dense<0.000000e+00> : vector<8x8xf32>
    %85 = tpu.matmul %84, %53, %cst_32 {dimension_numbers = #tpu.dot_dimension_numbers<[1], [0], [0], [1], [0, 0, 1, 1], [], []>} : vector<8x8xbf16>, vector<8x8xbf16>, vector<8x8xf32> -> vector<8x8xf32>
    %c8 = arith.constant 8 : index
    %c0_33 = arith.constant 0 : index
    %86 = vector.load %arg8[%c8, %c0_33] : memref<32x32xbf16, #tpu.memory_space<vmem>>, vector<8x32xbf16>
    %87 = arith.truncf %85 : vector<8x8xf32> to vector<8x8xbf16>
    %cst_34 = arith.constant dense<0.000000e+00> : vector<8x32xf32>
    %88 = tpu.matmul %87, %86, %cst_34 {dimension_numbers = #tpu.dot_dimension_numbers<[1], [0], [0], [1], [0, 0, 1, 1], [], []>} : vector<8x8xbf16>, vector<8x32xbf16>, vector<8x32xf32> -> vector<8x32xf32>
    %89 = arith.addf %71, %88 : vector<8x32xf32>
    %90 = vector.extract_strided_slice %43 {offsets = [0, 8], sizes = [8, 8], strides = [1, 1]} : vector<8x16xbf16> to vector<8x8xbf16>
    %91 = vector.extract_strided_slice %44 {offsets = [0, 8], sizes = [8, 8], strides = [1, 1]} : vector<8x16xbf16> to vector<8x8xbf16>
    %92 = vector.extract_strided_slice %42 {offsets = [0, 16], sizes = [8, 8], strides = [1, 1]} : vector<8x32xbf16> to vector<8x8xbf16>
    %cst_35 = arith.constant dense<0.000000e+00> : vector<8x8xf32>
    %93 = tpu.matmul %92, %90, %cst_35 {dimension_numbers = #tpu.dot_dimension_numbers<[1], [1], [0], [0], [0, 0, 1, 0], [], []>} : vector<8x8xbf16>, vector<8x8xbf16>, vector<8x8xf32> -> vector<8x8xf32>
    %94 = arith.addf %93, %50 : vector<8x8xf32>
    %cst_36 = arith.constant dense<0xFF800000> : vector<8xf32>
    %95 = vector.multi_reduction <maximumf>, %94, %cst_36 [1] : vector<8x8xf32> to vector<8xf32>
    %96 = vector.shape_cast %95 : vector<8xf32> to vector<8x1xf32>
    %97 = vector.broadcast %96 : vector<8x1xf32> to vector<8x8xf32>
    %98 = arith.subf %94, %97 : vector<8x8xf32>
    %99 = math.exp %98 : vector<8x8xf32>
    %cst_37 = arith.constant dense<0.000000e+00> : vector<8xf32>
    %100 = vector.multi_reduction <add>, %99, %cst_37 [1] : vector<8x8xf32> to vector<8xf32>
    %101 = vector.shape_cast %100 : vector<8xf32> to vector<8x1xf32>
    %102 = vector.broadcast %101 : vector<8x1xf32> to vector<8x8xf32>
    %103 = arith.divf %99, %102 : vector<8x8xf32>
    %104 = arith.truncf %103 : vector<8x8xf32> to vector<8x8xbf16>
    %cst_38 = arith.constant dense<0.000000e+00> : vector<8x8xf32>
    %105 = tpu.matmul %104, %91, %cst_38 {dimension_numbers = #tpu.dot_dimension_numbers<[1], [0], [0], [1], [0, 0, 1, 1], [], []>} : vector<8x8xbf16>, vector<8x8xbf16>, vector<8x8xf32> -> vector<8x8xf32>
    %c16 = arith.constant 16 : index
    %c0_39 = arith.constant 0 : index
    %106 = vector.load %arg8[%c16, %c0_39] : memref<32x32xbf16, #tpu.memory_space<vmem>>, vector<8x32xbf16>
    %107 = arith.truncf %105 : vector<8x8xf32> to vector<8x8xbf16>
    %cst_40 = arith.constant dense<0.000000e+00> : vector<8x32xf32>
    %108 = tpu.matmul %107, %106, %cst_40 {dimension_numbers = #tpu.dot_dimension_numbers<[1], [0], [0], [1], [0, 0, 1, 1], [], []>} : vector<8x8xbf16>, vector<8x32xbf16>, vector<8x32xf32> -> vector<8x32xf32>
    %109 = arith.addf %89, %108 : vector<8x32xf32>
    %110 = vector.extract_strided_slice %42 {offsets = [0, 24], sizes = [8, 8], strides = [1, 1]} : vector<8x32xbf16> to vector<8x8xbf16>
    %cst_41 = arith.constant dense<0.000000e+00> : vector<8x8xf32>
    %111 = tpu.matmul %110, %90, %cst_41 {dimension_numbers = #tpu.dot_dimension_numbers<[1], [1], [0], [0], [0, 0, 1, 0], [], []>} : vector<8x8xbf16>, vector<8x8xbf16>, vector<8x8xf32> -> vector<8x8xf32>
    %112 = arith.addf %111, %50 : vector<8x8xf32>
    %cst_42 = arith.constant dense<0xFF800000> : vector<8xf32>
    %113 = vector.multi_reduction <maximumf>, %112, %cst_42 [1] : vector<8x8xf32> to vector<8xf32>
    %114 = vector.shape_cast %113 : vector<8xf32> to vector<8x1xf32>
    %115 = vector.broadcast %114 : vector<8x1xf32> to vector<8x8xf32>
    %116 = arith.subf %112, %115 : vector<8x8xf32>
    %117 = math.exp %116 : vector<8x8xf32>
    %cst_43 = arith.constant dense<0.000000e+00> : vector<8xf32>
    %118 = vector.multi_reduction <add>, %117, %cst_43 [1] : vector<8x8xf32> to vector<8xf32>
    %119 = vector.shape_cast %118 : vector<8xf32> to vector<8x1xf32>
    %120 = vector.broadcast %119 : vector<8x1xf32> to vector<8x8xf32>
    %121 = arith.divf %117, %120 : vector<8x8xf32>
    %122 = arith.truncf %121 : vector<8x8xf32> to vector<8x8xbf16>
    %cst_44 = arith.constant dense<0.000000e+00> : vector<8x8xf32>
    %123 = tpu.matmul %122, %91, %cst_44 {dimension_numbers = #tpu.dot_dimension_numbers<[1], [0], [0], [1], [0, 0, 1, 1], [], []>} : vector<8x8xbf16>, vector<8x8xbf16>, vector<8x8xf32> -> vector<8x8xf32>
    %c24 = arith.constant 24 : index
    %c0_45 = arith.constant 0 : index
    %124 = vector.load %arg8[%c24, %c0_45] : memref<32x32xbf16, #tpu.memory_space<vmem>>, vector<8x32xbf16>
    %125 = arith.truncf %123 : vector<8x8xf32> to vector<8x8xbf16>
    %cst_46 = arith.constant dense<0.000000e+00> : vector<8x32xf32>
    %126 = tpu.matmul %125, %124, %cst_46 {dimension_numbers = #tpu.dot_dimension_numbers<[1], [0], [0], [1], [0, 0, 1, 1], [], []>} : vector<8x8xbf16>, vector<8x32xbf16>, vector<8x32xf32> -> vector<8x32xf32>
    %127 = arith.addf %109, %126 : vector<8x32xf32>
    %128 = arith.truncf %127 : vector<8x32xf32> to vector<8x32xbf16>
    %c0_47 = arith.constant 0 : index
    %c0_48 = arith.constant 0 : index
    %129 = vector.load %arg11[%c0_47, %c0_48] : memref<8x32xbf16, #tpu.memory_space<vmem>>, vector<8x32xbf16>
    tpu.vector_store %arg11[%c0_47, %c0_48], %128 {strides = array<i32>} : memref<8x32xbf16, #tpu.memory_space<vmem>>, vector<8x32xbf16>,
    return
  }
  func.func @transform_0(%arg0: i32) -> (i32, i32) {
    %c0_i32 = arith.constant 0 : i32
    %c0_i32_0 = arith.constant 0 : i32
    return %arg0, %c0_i32 : i32, i32
  }
  func.func @transform_1(%arg0: i32) -> (i32, i32) {
    %c0_i32 = arith.constant 0 : i32
    %c0_i32_0 = arith.constant 0 : i32
    %c0_i32_1 = arith.constant 0 : i32
    return %c0_i32, %c0_i32_0 : i32, i32
  }
  func.func @transform_2(%arg0: i32) -> (i32, i32) {
    %c0_i32 = arith.constant 0 : i32
    %c0_i32_0 = arith.constant 0 : i32
    %c0_i32_1 = arith.constant 0 : i32
    return %c0_i32, %c0_i32_0 : i32, i32
  }
  func.func @transform_3(%arg0: i32) -> (i32, i32) {
    %c0_i32 = arith.constant 0 : i32
    %c0_i32_0 = arith.constant 0 : i32
    %c0_i32_1 = arith.constant 0 : i32
    return %c0_i32, %c0_i32_0 : i32, i32
  }
  func.func @transform_4(%arg0: i32) -> (i32, i32) {
    %c0_i32 = arith.constant 0 : i32
    %c0_i32_0 = arith.constant 0 : i32
    %c0_i32_1 = arith.constant 0 : i32
    return %c0_i32, %c0_i32_0 : i32, i32
  }
  func.func @transform_5(%arg0: i32) -> (i32, i32) {
    %c0_i32 = arith.constant 0 : i32
    %c0_i32_0 = arith.constant 0 : i32
    %c0_i32_1 = arith.constant 0 : i32
    return %c0_i32, %c0_i32_0 : i32, i32
  }
  func.func @transform_6(%arg0: i32) -> (i32, i32) {
    %c0_i32 = arith.constant 0 : i32
    %c0_i32_0 = arith.constant 0 : i32
    %c0_i32_1 = arith.constant 0 : i32
    return %c0_i32, %c0_i32_0 : i32, i32
  }
  func.func @transform_7(%arg0: i32) -> (i32, i32) {
    %c0_i32 = arith.constant 0 : i32
    %c0_i32_0 = arith.constant 0 : i32
    %c0_i32_1 = arith.constant 0 : i32
    return %c0_i32, %c0_i32_0 : i32, i32
  }
  func.func @transform_8(%arg0: i32) -> (i32, i32) {
    %c0_i32 = arith.constant 0 : i32
    %c0_i32_0 = arith.constant 0 : i32
    %c0_i32_1 = arith.constant 0 : i32
    return %c0_i32, %c0_i32_0 : i32, i32
  }
  func.func @transform_9(%arg0: i32) -> (i32, i32) {
    %c0_i32 = arith.constant 0 : i32
    %c0_i32_0 = arith.constant 0 : i32
    %c0_i32_1 = arith.constant 0 : i32
    return %c0_i32, %c0_i32_0 : i32, i32
  }
  func.func @transform_10(%arg0: i32) -> (i32, i32) {
    %c0_i32 = arith.constant 0 : i32
    %c0_i32_0 = arith.constant 0 : i32
    return %arg0, %c0_i32 : i32, i32
  }
}

</mosaic_0001>

<bundles_post_ra>
// kernel: tpu_custom_call.1
= control target key start
LH: loop header
LB: loop body
LE: loop exit
PB: predicated region body
PF: predicated region fallthrough
CT: control target
= control target key end

     0   :  { %s2027_s0 = inlined_call_operand.vmem [shape: bf16[16,32], index: 0, kind: input, shape index: {}]   ;;  %s2028_s1 = inlined_call_operand.vmem [shape: bf16[32,32], index: 1, kind: input, shape index: {}]   ;;  %s2029_s2 = inlined_call_operand.vmem [shape: f32[1,32], index: 2, kind: input, shape index: {}]   ;;  %s2030_s3 = inlined_call_operand.vmem [shape: bf16[32,16], index: 3, kind: input, shape index: {}]   ;;  %s2031_s4 = inlined_call_operand.hbm [shape: f32[1,16], index: 4, kind: input, shape index: {}]   ;;  %s2032_s5 = inlined_call_operand.vmem [shape: bf16[32,16], index: 5, kind: input, shape index: {}]   ;;  %s2033_s6 = inlined_call_operand.vmem [shape: f32[1,16], index: 6, kind: input, shape index: {}]   ;;  %s2034_s7 = inlined_call_operand.vmem [shape: bf16[32,32], index: 7, kind: input, shape index: {}]   ;;  %s2035_s8 = inlined_call_operand.vmem [shape: f32[8,8], index: 8, kind: input, shape index: {}]   ;;  %s2036_s9 = inlined_call_operand.vmem [shape: f32[8,8], index: 9, kind: input, shape index: {}]   ;;  %s2037_s10 = inlined_call_operand.hbm [shape: bf16[16,32], index: 10, kind: output, shape index: {}]  }
   0x1   :  { %2038 = sst [smem:[#allocation9_spill]] %s2031_s4 }
   0x2   :  { %15 = vsyncpa [#allocation3], 0 }
   0x3   :  { %16 = vsyncpa [#allocation4], 0 }
   0x4   :  { %18 = vsyncpa [#allocation4 + $0x1], 0  ;;  %s1745_s13 = smov 0   ;;  %s1747_s14 = smov 0  }
   0x5   :  { %s1749_s15 = smov 0   ;;  %s1751_s16 = smov 0  }
   0x6 LB: > { %s1766_s17 = sadd.s32 4294967295, %s1675_s16   ;;  %s1337_s18 = sadd.s32 4294967294, %s1675_s16   ;;  %s1675_s16 = sphi %s1751_s16, %s2048_s16   ;;  %s1671_s15 = sphi %s1749_s15, %s2047_s15   ;;  %s1667_s14 = sphi %s1747_s14, %s2046_s14   ;;  %s1663_s13 = sphi %s1745_s13, %s2045_s13  }
   0x7   : > { %s1770_s19 = sadd.s32 1, %s1675_s16   ;;  %s246_s20 = sadd.s32 1, %s1671_s15 }
   0x8   : > { %s243_s21 = ssub.s32 %s1675_s16, %s1770_s19  ;;  %p256_p0 = scmp.ne.s32.totalorder %s1671_s15, %s1667_s14 }
   0x9   : > { %p244_p1 = scmp.eq.s32.totalorder %s243_s21, 0  ;;  %p257_p2 = scmp.eq.s32.totalorder %s1766_s17, 1 }
   0xa   : > { %p262_p3 = scmp.ne.s32.totalorder %s1667_s14, %s1663_s13  ;;  %p263_p4 = scmp.eq.s32.totalorder %s1337_s18, 1 }
   0xb   : > { %s1781_s22 = scalar_select %p244_p1, %s1671_s15, %s246_s20  }
   0xc   : > { %p1783_p5 = por %p257_p2, %p256_p0  ;;  %p1787_p6 = por %p263_p4, %p262_p3 }
   0xd   : > { %2039 = sst [smem:[#allocation8_spill]] %s1781_s22  ;;  %p1338_p7 = scmp.ge.s32.totalorder %s1675_s16, 1 }
   0xe   : > { %p270_p8 = scmp.lt.s32.totalorder %s1675_s16, 3  ;;  %p1516_p9 = scmp.eq.s32.totalorder %s1766_s17, 0 }
   0xf   : > { %s1677_s26 = smov [#allocation2]  }
  0x10   : > { %p1794_p10 = pnand %p1338_p7, %p270_p8  ;;  %s292_s27 = sshll.u32 %s1677_s26, 4  ;;  %s293_s27 = int_to_ptr.vmem [resolvable:$true] %s292_s27 }
  0x11   : > { %s1596_s28 = scalar_lea.vmem %s293_s27, 16  ;;  %s1603_s29 = scalar_lea.vmem %s293_s27, 32 }
  0x12   : > { %p1508_p11 = pneg %p1794_p10  ;;  %p1597_p0 = scmp.ne.s32.totalorder %s293_s27, %s1596_s28 }
  0x13   : > { %p1604_p3 = scmp.lt.s32.totalorder %s293_s27, %s293_s27  ;;  %p1605_p4 = scmp.lt.s32.totalorder %s1603_s29, %s1596_s28 }
  0x14   : > { %p1509_p12 = pnand %p1516_p9, %p1508_p11 }
  0x15   : > { %p1606_p7 = por %p1605_p4, %p1604_p3 }
  0x16   : > { %p1587_p13 = pneg %p1509_p12 }
  0x18   : > { %p1599_p1 = pnand %p1597_p0, %p1587_p13 }
  0x1a   : > { %p1600_p2 = pneg %p1599_p1 }
  0x1c   : > { %p1607_p8 = pnand %p1606_p7, %p1600_p2 }
  0x1e   : > { %1610 = shalt.err (!%p1607_p8)
}
  0x1f   : > { %s2043_s4 = sld [smem:[#allocation9_spill]] }
  0x21   : > { %327 = sbr.rel (%p1794_p10) target bundleno = 2637 (0xa4d), region = 60 }
  0x25   : > { %1511 = dma.hbm_to_vmem [thread:$0]  (!%p1509_p12), %s2043_s4, 16, %s293_s27, [#allocation3]  }
  0x26   : > { %1654 = dma.done.wait (%p1516_p9), [#allocation3], 16  }
  0x27   : > { %1656 = vsyncadd (%p1516_p9), [#allocation3], 4294967280  ;;  %p364_p11 = scmp.lt.s32.totalorder %s1766_s17, 1  ;;  %v1678_v0 = vmov 0.0   ;;  %vm1679_vm0 = vmmov 0   ;;  %v1563_v1 = vld [vmem:[%s2028_s1 + $0x8] sm:$0xff]   ;;  %v631_v58 = vlaneseq }
  0x28   : > { %1406 = vmatprep.subr.bf16.mxu0 %v1678_v0  ;;  %1410 = vmatprep.mubr.msk.bf16.mxu0 %vm1679_vm0, %v1678_v0  ;;  %v1564_v2 = vld [vmem:[%s2028_s1] sm:$0xff]   ;;  %v1565_v3 = vld [vmem:[%s2030_s3 + $0x8] sm:$0xff]   ;;  %s1680_s20 = smov 8   ;;  %vm393_vm1 = vcmask 261120   ;;  %s1682_s25 = smov 24   ;;  %vm602_vm2 = vcmask 31744  }
  0x29   : > { %1414 = vmatprep.subr.bf16.mxu1 %v1678_v0  ;;  %1418 = vmatprep.mubr.msk.bf16.mxu1 %vm1679_vm0, %v1678_v0  ;;  %s365_s12 = scalar_select %p364_p11, %s1766_s17, 1  ;;  %v1566_v4 = vld [vmem:[%s2030_s3] sm:$0xff]   ;;  %vm605_vm3 = vcmask 97280   ;;  %vm575_vm4 = vcmask 64512   ;;  %vm608_vm5 = vcmask 162816   ;;  %vm577_vm6 = vcmask 130048  }
  0x2a   : > { %1407 = vmatpush3.bf16.msra.mxu0 %v1563_v1  ;;  %v1838_v5 = vld [vmem:[%s2035_s8] sm:$0xff]  ;;  %1415 = vmatpush3.bf16.msra.mxu1 %v1565_v3  ;;  %s1683_s28 = smov 124   ;;  %vm611_vm7 = vcmask 228352   ;;  %vm579_vm8 = vcmask 195584   ;;  %s1685_s30 = smov 120   ;;  %v1567_v56 = vld [vmem:[%s2032_s5 + $0x8] sm:$0xff]  }
  0x2b   : > { %s1344_s21 = sshll.u32 %s365_s12, 2  ;;  %1408 = vmatprep.subr.bf16.mxu0 %v1678_v0  ;;  %566 = vrot.lane.b32.xlu1 %v1838_v5, %s1680_s20  ;;  %v564_v7 = vld [vmem:[%s2036_s9] sm:$0xff]  ;;  %v632_v59 = vshrl.u32 %v631_v58, 7  ;;  %v634_v60 = vand.u32 127, %v631_v58  ;;  %v1686_v61 = vmov -1e+09  }
  0x2c   : > { %s367_s29 = scalar_lea.vmem %s2027_s0, %s1344_s21  ;;  %1416 = vmatprep.subr.bf16.mxu1 %v1678_v0  ;;  %s1681_s21 = smov 16   ;;  %v1345_v8 = vld [vmem:[%s2029_s2] ss:$0 sm:$0xff]  ;;  %vm698_vm10 = vcmask 1043456   ;;  %vm1250_vm11 = vcmask 257024  }
  0x2d   : > { %v1841_v6 = vld [vmem:[%s367_s29] sm:$0xf]  ;;  %s1684_s29 = smov 4   ;;  %vm635_vm9 = vcmp.le.s32.totalorder %v634_v60, %v632_v59  ;;  %s1370_s22 = sshll.u32 %s1766_s17, 6 }
  0x2e   : > { %1409 = vmatpush3.bf16.msra.mxu0 %v1564_v2  ;;  %1417 = vmatpush3.bf16.msra.mxu1 %v1566_v4  ;;  %v1349_v11 = vld [vmem:[#allocation2] ss:$0 sm:$0xff]  ;;  %v1897_v62 = vsel %vm635_vm9, 0.0, %v1686_v61  ;;  %s1689_s11 = smov [#allocation5]  }
  0x2f   : > { %1422 = vmatprep.subr.bf16.mxu0 %v1678_v0  ;;  %1430 = vmatprep.subr.bf16.mxu1 %v1678_v0  ;;  %v1568_v57 = vld [vmem:[%s2032_s5] sm:$0xff]   ;;  %s1615_s12 = sshll.u32 %s1689_s11, 4  ;;  %s1616_s12 = int_to_ptr.vmem [resolvable:$false] %s1615_s12 }
  0x30   : > { %582 = vrot.lane.b32.xlu1 %v564_v7, %s1680_s20  ;;  %s361_s20 = sand.u32 1, %s1667_s14  }
  0x31   : > { %1411 = vmatmul.mubr.msk.bf16.vlgmr.msra.gmra.mxu0 %vm393_vm1, %v1841_v6  ;;  %1419 = vmatmul.mubr.msk.bf16.vlgmr.msra.gmra.mxu1 %vm393_vm1, %v1841_v6  ;;  %s1343_s4 = sshll.u32 %s361_s20, 2  ;;  %s1253_s17 = scalar_lea.sflag [#allocation4], %s361_s20 }
  0x32   : > { %1426 = vmatprep.mubr.msk.bf16.mxu0 %vm1679_vm0, %v1678_v0  ;;  %1432 = vmatprep.mubr.msk.bf16.mxu1 %vm1679_vm0, %v1678_v0 }
  0x33   : > { %1423 = vmatpush3.bf16.msra.mxu0 %v1567_v56 }
  0x34   : > { %585 = vrot.lane.b32.xlu1 %v564_v7, %s1681_s21  ;;  %1424 = vmatprep.subr.bf16.mxu0 %v1678_v0 }
  0x37   : > { %1425 = vmatpush3.bf16.msra.mxu0 %v1568_v57 }
  0x38   : > { %588 = vrot.lane.b32.xlu1 %v564_v7, %s1682_s25  ;;  %1436 = vmatprep.subr.bf16.mxu0 %v1678_v0 }
  0x3a   : > { %1427 = vmatmul.mubr.msk.bf16.vlgmr.msra.gmra.mxu0 %vm393_vm1, %v1841_v6 }
  0x3b   : > { %1438 = vmatprep.mubr.msk.bf16.mxu0 %vm1679_vm0, %v1678_v0 }
  0x9d   : > { %v567_v20 = vpop.permute.xlu1 %566 }
  0x9e   : > { %v576_v35 = vsel %vm575_vm4, %v1838_v5, %v567_v20 }
  0xa2   : > { %v583_v21 = vpop.permute.xlu1 %582 }
  0xa3   : > { %v591_v27 = vsel %vm575_vm4, %v564_v7, %v583_v21 }
  0xa6   : > { %v586_v23 = vpop.permute.xlu1 %585 }
  0xa7   : > { %v592_v32 = vsel %vm577_vm6, %v591_v27, %v586_v23 }
  0xaa   : > { %v589_v33 = vpop.permute.xlu1 %588 }
  0xab   : > { %v593_v39 = vsel %vm579_vm8, %v592_v32, %v589_v33 }
  0xf1   : > { %v431_v9 = vpop.f32.mrf.mxu0  ;;  %v494_v13 = vpop.f32.mrf.mxu1 }
  0xf2   : > { %v432_v10 = vadd.f32 %v1345_v8, %v431_v9  ;;  %v495_v15 = vadd.f32 %v1349_v11, %v494_v13 }
  0xf3   : > { %v1412_v12 = vpop.f32.mrf.mxu0  ;;  %v1420_v16 = vpop.f32.mrf.mxu1 }
  0xf4   : > { %596 = vrot.lane.b32.xlu0 %v432_v10, %s1683_s28  ;;  %620 = vrot.lane.b32.xlu1 %v495_v15, %s1684_s29  ;;  %v615_v50 = vmul.f32 %v576_v35, %v495_v15 }
  0xf5   : > { %v434_v14 = vpop.f32.mrf.mxu0  ;;  %v497_v18 = vpop.f32.mrf.mxu1 }
  0xf7   : > { %v1413_v17 = vpop.f32.mrf.mxu0  ;;  %v1421_v19 = vpop.f32.mrf.mxu1 }
  0xf8   : > { %599 = vrot.lane.b32.xlu0 %v432_v10, %s1684_s29  ;;  %v1353_v17 = vld [vmem:[%s2033_s6] ss:$0 sm:$0xff]  ;;  %s1688_s29 = smov 104  }
  0xfa   : > { %v557_v18 = vpop.f32.mrf.mxu0 }
  0xfb   : > { %v558_v19 = vadd.f32 %v1353_v17, %v557_v18 }
  0xfc   : > { %569 = vrot.lane.b32.xlu0 %v1838_v5, %s1681_s21  ;;  %v1428_v20 = vpop.f32.mrf.mxu0  ;;  %s1687_s21 = smov 112  }
  0xfd   : > { %v1908_v21 = vpack.c.bf16 %v558_v19, %v558_v19 }
  0xff   : > { %v700_v23 = vsel %vm698_vm10, %v1908_v21, 0 }
 0x100   : > { %572 = vrot.lane.b32.xlu0 %v1838_v5, %s1682_s25  ;;  %1437 = vmatpush3.bf16.msra.mxu0 %v700_v23 }
 0x101   : > { %1448 = vmatprep.subr.bf16.mxu0 %v1678_v0 }
 0x104   : > { %617 = vrot.lane.b32.xlu0 %v495_v15, %s1683_s28  ;;  %s1986_s28 = scalar_lea.hbm %s2037_s10, %s1370_s22 }
 0x166   : > { %v597_v22 = vpop.permute.xlu0 %596  ;;  %v621_v43 = vpop.permute.xlu1 %620 }
 0x16a   : > { %v600_v24 = vpop.permute.xlu0 %599 }
 0x16b   : > { %v603_v25 = vsel %vm602_vm2, %v597_v22, %v600_v24 }
 0x16c   : > { %v604_v26 = vsel %vm575_vm4, %v603_v25, %v597_v22 }
 0x16d   : > { %v606_v28 = vsel %vm605_vm3, %v604_v26, %v600_v24 }
 0x16e   : > { %v607_v29 = vsel %vm577_vm6, %v606_v28, %v597_v22  ;;  %v570_v30 = vpop.permute.xlu0 %569 }
 0x16f   : > { %v609_v31 = vsel %vm608_vm5, %v607_v29, %v600_v24  ;;  %v578_v37 = vsel %vm577_vm6, %v576_v35, %v570_v30 }
 0x170   : > { %v610_v34 = vsel %vm579_vm8, %v609_v31, %v597_v22  ;;  %v560_v22 = vpop.f32.mrf.mxu0 }
 0x171   : > { %v612_v36 = vsel %vm611_vm7, %v610_v34, %v600_v24  ;;  %v845_v34 = vld [vmem:[%s2034_s7 + $0x4] sm:$0xf] }
 0x172   : > { %v573_v38 = vpop.permute.xlu0 %572  ;;  %v613_v41 = vmul.f32 %v612_v36, %v593_v39  ;;  %v1429_v24 = vpop.f32.mrf.mxu0  ;;  %v851_v35 = vsel %vm698_vm10, %v845_v34, 0 }
 0x173   : > { %v580_v40 = vsel %vm579_vm8, %v578_v37, %v573_v38  ;;  %v742_v38 = vld [vmem:[%s2034_s7] sm:$0xf] }
 0x174   : > { %v594_v42 = vmul.f32 %v580_v40, %v432_v10 }
 0x176   : > { %v614_v44 = vadd.f32 %v613_v41, %v594_v42  ;;  %v618_v45 = vpop.permute.xlu0 %617  ;;  %v897_v41 = vsel %vm698_vm10, %v742_v38, 0 }
 0x177   : > { %v623_v46 = vsel %vm602_vm2, %v618_v45, %v621_v43 }
 0x178   : > { %v1869_v47 = vpack.c.bf16 %v614_v44, %v614_v44  ;;  %v624_v48 = vsel %vm575_vm4, %v623_v46, %v618_v45 }
 0x179   : > { %v625_v49 = vsel %vm605_vm3, %v624_v48, %v621_v43 }
 0x17a   : > { %v626_v51 = vmul.f32 %v625_v49, %v591_v27  ;;  %745 = vrot.lane.b32.xlu0 %v1869_v47, %s1685_s30 }
 0x17c   : > { %v627_v52 = vadd.f32 %v626_v51, %v615_v50 }
 0x17e   : > { %v629_v53 = vpack.c.bf16 %v627_v52, %v627_v52 }
 0x180   : > { %v641_v54 = vsel %vm575_vm4, %v629_v53, 0 }
 0x181   : > { %1431 = vmatpush3.bf16.xpose.msra.mxu1 %v641_v54 }
 0x182   : > { %1442 = vmatprep.subr.bf16.mxu1 %v1678_v0 }
 0x188   : > { %1433 = vmatmul.mubr.msk.bf16.vlgmr.msra.gmra.mxu1 %vm575_vm4, %v1869_v47 }
 0x189   : > { %1443 = vmatpush3.bf16.xpose.msra.mxu1 %v641_v54  ;;  %1444 = vmatprep.mubr.msk.bf16.mxu1 %vm1679_vm0, %v1678_v0 }
 0x18a   : > { %1454 = vmatprep.subr.bf16.mxu1 %v1678_v0 }
 0x1ec   : > { %v746_v55 = vpop.permute.xlu0 %745 }
 0x1ed   : > { %1445 = vmatmul.mubr.msk.bf16.vlgmr.msra.gmra.mxu1 %vm575_vm4, %v746_v55 }
 0x1ee   : > { %1456 = vmatprep.mubr.msk.bf16.mxu1 %vm1679_vm0, %v1678_v0  ;;  %1455 = vmatpush3.bf16.msra.mxu1 %v851_v35 }
 0x1ef   : > { %1466 = vmatprep.subr.bf16.mxu1 %v1678_v0 }
 0x248   : > { %v677_v63 = vpop.f32.mrf.mxu1 }
 0x249   : > { %v678_v1 = vadd.f32 %v677_v63, %v1897_v62 }
 0x24a   : > { %v1434_v2 = vpop.f32.mrf.mxu1 }
 0x24b   : > { %v683_v3 = vsel %vm575_vm4, %v678_v1, -inf }
 0x24c   : > { %684 = vmax.xlane.f32.xlu1 %v683_v3  ;;  %v680_v4 = vpop.f32.mrf.mxu1 }
 0x24e   : > { %v1435_v5 = vpop.f32.mrf.mxu1 }
 0x2ad   : > { %v784_v7 = vpop.f32.mrf.mxu1 }
 0x2ae   : > { %v785_v6 = vadd.f32 %v784_v7, %v1897_v62 }
 0x2af   : > { %v1446_v8 = vpop.f32.mrf.mxu1 }
 0x2b0   : > { %v790_v9 = vsel %vm575_vm4, %v785_v6, -inf }
 0x2b1   : > { %791 = vmax.xlane.f32.xlu0 %v790_v9  ;;  %v787_v10 = vpop.f32.mrf.mxu1 }
 0x2b3   : > { %v1447_v11 = vpop.f32.mrf.mxu1 }
 0x2d5   : > { %v685_v12 = vpop.xlane.xlu1 %684 }
 0x2d6   : > { %v686_v13 = vsub.f32 %v678_v1, %v685_v12 }
 0x2d8   : > { %v687_v14 = vmul.f32 1.442695, %v686_v13  ;;  %v1051_v13 = vld [vmem:[%s2034_s7 + $0x8] sm:$0xf] }
 0x2da   : > { %1569 = vpow2.f32 %v687_v14  ;;  %v1057_v14 = vsel %vm698_vm10, %v1051_v13, 0 }
 0x2e7   : > { %v1570_v15 = vpop.eup %1569 }
 0x2e8   : > { %v689_v16 = vsel %vm575_vm4, %v1570_v15, 0.0 }
 0x2e9   : > { %690 = vadd.xlane.f32.xlu0 %v689_v16 }
 0x2ff   : > { %942 = vrot.lane.b32.xlu0 %v629_v53, %s1685_s30 }
 0x33a   : > { %v792_v25 = vpop.xlane.xlu0 %791 }
 0x33b   : > { %v793_v26 = vsub.f32 %v785_v6, %v792_v25 }
 0x33d   : > { %v794_v27 = vmul.f32 1.442695, %v793_v26 }
 0x33f   : > { %1571 = vpow2.f32 %v794_v27 }
 0x34c   : > { %v1572_v28 = vpop.eup %1571 }
 0x34d   : > { %v796_v29 = vsel %vm575_vm4, %v1572_v28, 0.0 }
 0x34e   : > { %797 = vadd.xlane.f32.xlu1 %v796_v29 }
 0x35f   : > { %939 = vrot.lane.b32.xlu1 %v1869_v47, %s1687_s21  ;;  %s363_s21 = scalar_lea.vmem [#allocation5], %s1343_s4 }
 0x360   : > { %s1266_s25 = sshll.u32 %s363_s21, 4  ;;  %s1988_s25 = int_to_ptr.vmem [resolvable:$true] %s1266_s25 }
 0x361   : > { %p1618_p13 = scmp.lt.s32.totalorder %s1988_s25, %s1616_s12 }
 0x372   : > { %v691_v30 = vpop.xlane.xlu0 %690 }
 0x373   : > { %1573 = vrcp.f32 %v691_v30 }
 0x376   : > { %v943_v48 = vpop.permute.xlu0 %942 }
 0x377   : > { %v948_v52 = vsel %vm575_vm4, %v943_v48, 0 }
 0x380   : > { %v1574_v31 = vpop.eup %1573 }
 0x381   : > { %v693_v32 = vmul.f32 %v1574_v31, %v1570_v15 }
 0x383   : > { %v694_v33 = vpack.c.bf16 %v693_v32, %v693_v32 }
 0x385   : > { %1439 = vmatmul.mubr.msk.bf16.vlgmr.msra.gmra.mxu0 %vm575_vm4, %v694_v33 }
 0x386   : > { %1449 = vmatpush3.bf16.msra.mxu0 %v700_v23  ;;  %1450 = vmatprep.mubr.msk.bf16.mxu0 %vm1679_vm0, %v1678_v0 }
 0x387   : > { %1460 = vmatprep.subr.bf16.mxu0 %v1678_v0 }
 0x3d7   : > { %v798_v36 = vpop.xlane.xlu1 %797 }
 0x3d8   : > { %1575 = vrcp.f32 %v798_v36 }
 0x3db   : > { %v940_v55 = vpop.permute.xlu1 %939 }
 0x3e5   : > { %v1576_v37 = vpop.eup %1575 }
 0x3e6   : > { %v800_v39 = vmul.f32 %v1576_v37, %v1572_v28 }
 0x3e8   : > { %v801_v40 = vpack.c.bf16 %v800_v39, %v800_v39  ;;  %v1200_v39 = vld [vmem:[%s2034_s7 + $0xc] sm:$0xf] }
 0x3ea   : > { %1451 = vmatmul.mubr.msk.bf16.vlgmr.msra.gmra.mxu0 %vm575_vm4, %v801_v40  ;;  %v1206_v40 = vsel %vm698_vm10, %v1200_v39, 0 }
 0x3eb   : > { %1461 = vmatpush3.bf16.msra.mxu0 %v897_v41  ;;  %1462 = vmatprep.mubr.msk.bf16.mxu0 %vm1679_vm0, %v1678_v0 }
 0x3ec   : > { %1472 = vmatprep.subr.bf16.mxu0 %v1678_v0 }
 0x445   : > { %v736_v42 = vpop.f32.mrf.mxu0 }
 0x446   : > { %v743_v43 = vpack.c.bf16 %v736_v42, %v736_v42 }
 0x447   : > { %v1440_v44 = vpop.f32.mrf.mxu0 }
 0x448   : > { %1463 = vmatmul.mubr.msk.bf16.vlgmr.msra.gmra.mxu0 %vm575_vm4, %v743_v43 }
 0x449   : > { %v739_v45 = vpop.f32.mrf.mxu0  ;;  %1474 = vmatprep.mubr.msk.bf16.mxu0 %vm1679_vm0, %v1678_v0 }
 0x44b   : > { %v1441_v46 = vpop.f32.mrf.mxu0 }
 0x4aa   : > { %v839_v49 = vpop.f32.mrf.mxu0 }
 0x4ab   : > { %v846_v50 = vpack.c.bf16 %v839_v49, %v839_v49 }
 0x4ac   : > { %v1452_v51 = vpop.f32.mrf.mxu0 }
 0x4ad   : > { %1457 = vmatmul.mubr.msk.bf16.vlgmr.msra.gmra.mxu1 %vm575_vm4, %v846_v50 }
 0x4ae   : > { %1467 = vmatpush3.bf16.xpose.msra.mxu1 %v948_v52  ;;  %v842_v53 = vpop.f32.mrf.mxu0  ;;  %1468 = vmatprep.mubr.msk.bf16.mxu1 %vm1679_vm0, %v1678_v0 }
 0x4af   : > { %1478 = vmatprep.subr.bf16.mxu1 %v1678_v0 }
 0x4b0   : > { %v1453_v54 = vpop.f32.mrf.mxu0 }
 0x4b5   : > { %1469 = vmatmul.mubr.msk.bf16.vlgmr.msra.gmra.mxu1 %vm575_vm4, %v940_v55 }
 0x4b6   : > { %1480 = vmatprep.mubr.msk.bf16.mxu1 %vm1679_vm0, %v1678_v0  ;;  %1479 = vmatpush3.bf16.msra.mxu1 %v1057_v14 }
 0x4b7   : > { %1490 = vmatprep.subr.bf16.mxu1 %v1678_v0 }
 0x508   : > { %v1943_v56 = vpop.f32.mrf.mxu0 }
 0x50a   : > { %v1464_v57 = vpop.f32.mrf.mxu0 }
 0x50c   : > { %v936_v58 = vpop.f32.mrf.mxu0 }
 0x50e   : > { %v1465_v59 = vpop.f32.mrf.mxu0 }
 0x56d   : > { %v1945_v60 = vpop.f32.mrf.mxu1 }
 0x56f   : > { %v1458_v61 = vpop.f32.mrf.mxu1 }
 0x571   : > { %v890_v63 = vpop.f32.mrf.mxu1 }
 0x573   : > { %v1459_v1 = vpop.f32.mrf.mxu1 }
 0x575   : > { %v984_v2 = vpop.f32.mrf.mxu1 }
 0x576   : > { %v985_v3 = vadd.f32 %v984_v2, %v1897_v62 }
 0x577   : > { %v1470_v4 = vpop.f32.mrf.mxu1 }
 0x578   : > { %v990_v5 = vsel %vm575_vm4, %v985_v3, -inf }
 0x579   : > { %991 = vmax.xlane.f32.xlu1 %v990_v5  ;;  %v987_v7 = vpop.f32.mrf.mxu1 }
 0x57b   : > { %v1471_v6 = vpop.f32.mrf.mxu1 }
 0x58a   : > { %1100 = vrot.lane.b32.xlu1 %v1869_v47, %s1688_s29  ;;  %s1611_s29 = scalar_lea.vmem %s1988_s25, 64 }
 0x58b   : > { %p1612_p9 = scmp.ne.s32.totalorder %s1988_s25, %s1611_s29 }
 0x58d   : > { %p1613_p10 = pnand %p1612_p9, %p1783_p5 }
 0x58f   : > { %p1614_p12 = pneg %p1613_p10 }
 0x602   : > { %v992_v8 = vpop.xlane.xlu1 %991 }
 0x603   : > { %v993_v9 = vsub.f32 %v985_v3, %v992_v8 }
 0x605   : > { %v994_v10 = vmul.f32 1.442695, %v993_v9 }
 0x606   : > { %v1101_v20 = vpop.permute.xlu1 %1100 }
 0x607   : > { %1577 = vpow2.f32 %v994_v10 }
 0x614   : > { %v1578_v11 = vpop.eup %1577 }
 0x615   : > { %v996_v12 = vsel %vm575_vm4, %v1578_v11, 0.0 }
 0x616   : > { %997 = vadd.xlane.f32.xlu0 %v996_v12 }
 0x62c   : > { %1003 = vrot.lane.b32.xlu0 %v1908_v21, %s1685_s30  ;;  %s1617_s30 = scalar_lea.vmem %s1616_s12, 128 }
 0x62d   : > { %p1619_p0 = scmp.lt.s32.totalorder %s1617_s30, %s1611_s29 }
 0x62f   : > { %p1620_p1 = por %p1619_p0, %p1618_p13 }
 0x631   : > { %p1621_p2 = pnand %p1620_p1, %p1614_p12 }
 0x69f   : > { %v998_v47 = vpop.xlane.xlu0 %997 }
 0x6a0   : > { %1579 = vrcp.f32 %v998_v47 }
 0x6a3   : > { %v1004_v15 = vpop.permute.xlu0 %1003 }
 0x6a4   : > { %v1009_v16 = vsel %vm698_vm10, %v1004_v15, 0 }
 0x6a5   : > { %1473 = vmatpush3.bf16.msra.mxu0 %v1009_v16 }
 0x6a6   : > { %1484 = vmatprep.subr.bf16.mxu0 %v1678_v0 }
 0x6ad   : > { %v1580_v17 = vpop.eup %1579 }
 0x6ae   : > { %v1000_v18 = vmul.f32 %v1580_v17, %v1578_v11 }
 0x6b0   : > { %v1001_v19 = vpack.c.bf16 %v1000_v18, %v1000_v18 }
 0x6b2   : > { %1475 = vmatmul.mubr.msk.bf16.vlgmr.msra.gmra.mxu0 %vm575_vm4, %v1001_v19 }
 0x6b3   : > { %1485 = vmatpush3.bf16.xpose.msra.mxu0 %v948_v52  ;;  %1486 = vmatprep.mubr.msk.bf16.mxu0 %vm1679_vm0, %v1678_v0 }
 0x6b4   : > { %1496 = vmatprep.subr.bf16.mxu0 %v1678_v0 }
 0x6ba   : > { %1487 = vmatmul.mubr.msk.bf16.vlgmr.msra.gmra.mxu0 %vm575_vm4, %v1101_v20 }
 0x6bb   : > { %1498 = vmatprep.mubr.msk.bf16.mxu0 %vm1679_vm0, %v1678_v0  ;;  %1497 = vmatpush3.bf16.msra.mxu0 %v1206_v40 }
 0x772   : > { %v1045_v21 = vpop.f32.mrf.mxu0 }
 0x773   : > { %v1052_v22 = vpack.c.bf16 %v1045_v21, %v1045_v21 }
 0x774   : > { %v1476_v23 = vpop.f32.mrf.mxu0 }
 0x775   : > { %1481 = vmatmul.mubr.msk.bf16.vlgmr.msra.gmra.mxu1 %vm575_vm4, %v1052_v22 }
 0x776   : > { %1491 = vmatpush3.bf16.msra.mxu1 %v1009_v16  ;;  %v1048_v24 = vpop.f32.mrf.mxu0  ;;  %1492 = vmatprep.mubr.msk.bf16.mxu1 %vm1679_vm0, %v1678_v0  ;;  %v934_v0 = vadd.f32 %v1943_v56, %v1945_v60 }
 0x778   : > { %v1477_v25 = vpop.f32.mrf.mxu0 }
 0x77a   : > { %v1139_v26 = vpop.f32.mrf.mxu0 }
 0x77b   : > { %v1140_v27 = vadd.f32 %v1139_v26, %v1897_v62 }
 0x77c   : > { %v1488_v28 = vpop.f32.mrf.mxu0 }
 0x77d   : > { %v1145_v29 = vsel %vm575_vm4, %v1140_v27, -inf }
 0x77e   : > { %1146 = vmax.xlane.f32.xlu1 %v1145_v29  ;;  %v1142_v30 = vpop.f32.mrf.mxu0 }
 0x780   : > { %v1489_v31 = vpop.f32.mrf.mxu0 }
 0x807   : > { %v1147_v32 = vpop.xlane.xlu1 %1146 }
 0x808   : > { %v1148_v33 = vsub.f32 %v1140_v27, %v1147_v32 }
 0x80a   : > { %v1149_v34 = vmul.f32 1.442695, %v1148_v33 }
 0x80c   : > { %1581 = vpow2.f32 %v1149_v34 }
 0x819   : > { %v1582_v35 = vpop.eup %1581 }
 0x81a   : > { %v1151_v36 = vsel %vm575_vm4, %v1582_v35, 0.0 }
 0x81b   : > { %1152 = vadd.xlane.f32.xlu0 %v1151_v36 }
 0x835   : > { %v1093_v37 = vpop.f32.mrf.mxu1 }
 0x836   : > { %v1099_v38 = vadd.f32 %v1093_v37, %v934_v0 }
 0x837   : > { %v1482_v62 = vpop.f32.mrf.mxu1 }
 0x839   : > { %v1096_v41 = vpop.f32.mrf.mxu1 }
 0x83b   : > { %v1483_v42 = vpop.f32.mrf.mxu1 }
 0x8a4   : > { %v1153_v43 = vpop.xlane.xlu0 %1152 }
 0x8a5   : > { %1583 = vrcp.f32 %v1153_v43 }
 0x8b2   : > { %v1584_v44 = vpop.eup %1583 }
 0x8b3   : > { %v1155_v45 = vmul.f32 %v1584_v44, %v1582_v35 }
 0x8b5   : > { %v1156_v46 = vpack.c.bf16 %v1155_v45, %v1155_v45 }
 0x8b7   : > { %1493 = vmatmul.mubr.msk.bf16.vlgmr.msra.gmra.mxu1 %vm575_vm4, %v1156_v46 }
 0x977   : > { %v1194_v48 = vpop.f32.mrf.mxu1 }
 0x978   : > { %v1201_v49 = vpack.c.bf16 %v1194_v48, %v1194_v48 }
 0x979   : > { %v1494_v50 = vpop.f32.mrf.mxu1 }
 0x97a   : > { %1499 = vmatmul.mubr.msk.bf16.vlgmr.msra.gmra.mxu0 %vm575_vm4, %v1201_v49 }
 0x97b   : > { %v1197_v51 = vpop.f32.mrf.mxu1 }
 0x97d   : > { %v1495_v52 = vpop.f32.mrf.mxu1 }
 0xa3a   : > { %v1242_v53 = vpop.f32.mrf.mxu0 }
 0xa3b   : > { %v1248_v54 = vadd.f32 %v1242_v53, %v1099_v38 }
 0xa3c   : > { %v1500_v55 = vpop.f32.mrf.mxu0 }
 0xa3d   : > { %v1249_v56 = vpack.c.bf16 %v1248_v54, %v1248_v54 }
 0xa3e   : > { %v1245_v57 = vpop.f32.mrf.mxu0 }
 0xa3f   : > { %1251 = vst.msk [vmem:[%s363_s21] sm:$0xf] %vm1250_vm11, %v1249_v56 }
 0xa40   : > { %v1501_v58 = vpop.f32.mrf.mxu0 }
 0xa41   : > { %1624 = shalt.err (!%p1621_p2)
}
 0xa42   : > { %s1625_s18 = scalar_lea.hbm %s1986_s28, 64  ;;  %s1629_s22 = scalar_lea.hbm %s2037_s10, 128 }
 0xa43   : > { %p1626_p3 = scmp.ne.s32.totalorder %s1986_s28, %s1625_s18  ;;  %p1630_p8 = scmp.lt.s32.totalorder %s1986_s28, %s2037_s10 }
 0xa44   : > { %p1631_p11 = scmp.lt.s32.totalorder %s1629_s22, %s1625_s18 }
 0xa45   : > { %p1627_p4 = pnand %p1626_p3, %p1783_p5 }
 0xa46   : > { %p1632_p9 = por %p1631_p11, %p1630_p8 }
 0xa47   : > { %p1628_p7 = pneg %p1627_p4 }
 0xa49   : > { %p1633_p10 = pnand %p1632_p9, %p1628_p7 }
 0xa4b   : > { %1636 = shalt.err (!%p1633_p10)
}
 0xa4c   : > { %1506 = dma.vmem_to_hbm [thread:$0]  (%p1783_p5), %s1988_s25, 64, %s1986_s28, %s1253_s17  }
 0xa4d PF: > { %p1518_p12 = scmp.ge.s32.totalorder %s1675_s16, 2  ;;  %s1278_s27 = sand.u32 1, %s1663_s13  }
 0xa4e   : > { %s1279_s29 = scalar_lea.sflag [#allocation4], %s1278_s27 }
 0xa4f   : > { %p1513_p13 = pnand %p1518_p12, %p1787_p6 }
 0xa51   : > { %p1514_p0 = pneg %p1513_p13 }
 0xa53   : > { %1658 = dma.done.wait (%p1514_p0), %s1279_s29, 64  }
 0xa54   : > { %1660 = vsyncadd (%p1514_p0), %s1279_s29, 4294967232  ;;  %s2044_s11 = sld [smem:[#allocation8_spill]]  ;;  %p21_p1 = scmp.ge.s32.totalorder %s1770_s19, 4  }
 0xa55   : > { %s2045_s13 = smov %s1667_s14  ;;  %s2046_s14 = smov %s1671_s15 }
 0xa56   : > { %s2048_s16 = smov %s1770_s19  ;;  %23 = sbr.rel (!%p21_p1) target bundleno = 6 (0x6), region = 100 }
 0xa5a   : > { %s2047_s15 = smov %s2044_s11 }
 0xa5b   :  { %1284 = vsyncpa [#allocation3], 1 }
 0xa5c   :  { %1286 = vsyncpa [#allocation3 + $0x1], 1 }
 0xa5d   :  { %1287 = vsyncpa [#allocation4], 1 }
 0xa5e   :  { %1289 = vsyncpa [#allocation4 + $0x1], 1 }

</bundles_post_ra>
